<compile_context>
chip_gen: v7x
topology: tpu7x:2x2x1
jax: 0.10.0
libtpu: 0.0.40
codegen_flags: <defaults>
</compile_context>

<pallas_src>
import jax
import jax.numpy as jnp
from jax.experimental import pallas as pl
from jax.experimental.pallas import tpu as pltpu

_LN_EPS = 1e-12  # TF-style LayerNorm epsilon (matches the PyTorch module).


# ---------------------------------------------------------------------------
# Shared epilogue: residual add + TF-style LayerNorm + affine (all f32).
# ---------------------------------------------------------------------------
def _residual_layernorm(h, x, b_out, gamma, beta, out_dtype):
    y = h + b_out + x
    inv_h = 1.0 / y.shape[-1]                        # Python constant
    u = jnp.sum(y, axis=-1, keepdims=True) * inv_h   # mean
    ssq = jnp.sum(y * y, axis=-1, keepdims=True) * inv_h
    var = jnp.maximum(ssq - u * u, 0.0)              # single-pass variance
    yn = (y - u) * jax.lax.rsqrt(var + _LN_EPS)      # rsqrt -> EUP slot
    return (gamma * yn + beta).astype(out_dtype)


# ---------------------------------------------------------------------------
# Variant A kernel: weights resident in VMEM, rows streamed.
# ---------------------------------------------------------------------------
def _kernel_resident(x_ref, w_in_ref, b_in_ref, w_out_ref, b_out_ref,
                     gamma_ref, beta_ref, o_ref):
    x = x_ref[...]                                               # (tm, H) f32
    h = jnp.dot(x.astype(jnp.bfloat16), w_in_ref[...],
                preferred_element_type=jnp.float32)              # MXU (tm, I)
    h = jnp.maximum(h + b_in_ref[...], 0.0).astype(jnp.bfloat16)  # bias+ReLU
    h = jnp.dot(h, w_out_ref[...],
                preferred_element_type=jnp.float32)              # MXU (tm, H)
    # dropout (eval mode): identity
    o_ref[...] = _residual_layernorm(h, x, b_out_ref[...], gamma_ref[...],
                                     beta_ref[...], o_ref.dtype)


# ---------------------------------------------------------------------------
# Variant B kernel: K-tiled over the intermediate dim, weights streamed.
# ---------------------------------------------------------------------------
def _kernel_ktiled(x_ref, w_in_ref, b_in_ref, w_out_ref, b_out_ref,
                   gamma_ref, beta_ref, o_ref, acc_ref):
    k = pl.program_id(1)

    @pl.when(k == 0)
    def _():
        acc_ref[...] = jnp.zeros_like(acc_ref)

    h = jnp.dot(x_ref[...].astype(jnp.bfloat16), w_in_ref[...],
                preferred_element_type=jnp.float32)              # (tm, ti) f32
    h = jnp.maximum(h + b_in_ref[...], 0.0).astype(jnp.bfloat16)
    acc_ref[...] += jnp.dot(h, w_out_ref[...],
                            preferred_element_type=jnp.float32)  # (tm, H) f32

    @pl.when(k == pl.num_programs(1) - 1)
    def _():
        o_ref[...] = _residual_layernorm(acc_ref[...], x_ref[...],
                                         b_out_ref[...], gamma_ref[...],
                                         beta_ref[...], o_ref.dtype)


# ---------------------------------------------------------------------------
# Sizing helpers (generation-aware).
# ---------------------------------------------------------------------------
def _vmem_capacity_bytes():
    try:
        cap = int(pltpu.get_tpu_info().vmem_capacity_bytes)
        if cap > 0:
            return cap
    except Exception:
        pass
    return 64 * 1024 * 1024  # conservative fallback (v7x per-TensorCore)


def _pick_tm(n_rows, hidden, inter_cols, cap, resident_bytes):
    """Row-tile size: multiple of 8, as large as possible (up to 1024) so the
    ~0.35us per-step overhead and MXU fill/drain are amortized, while the
    tm-scaled buffers (double-buffered x/out tiles, the (tm, inter_cols)
    activation slab, the f32 accumulator) plus the resident bytes fit ~80% of
    this generation's VMEM."""
    small_params = 4 * (inter_cols + 3 * hidden) * 4      # biases/gamma/beta
    budget = int(0.80 * cap) - resident_bytes - small_params
    # per-row bytes: x/out (2x f32 each) + h (bf16 + f32 matmul result) + y/acc
    per_row = 16 * hidden + 6 * inter_cols + 8 * hidden
    tm = 1024
    while tm > 256 and tm * per_row > budget:
        tm //= 2
    if n_rows <= 8:
        tm = n_rows                       # full-extent block for tiny inputs
    elif n_rows < tm:
        tm = max(8, (n_rows // 8) * 8)    # stay a multiple of 8, <= n_rows
    return tm


def _pick_ti(inter, ti=None):
    """Intermediate-dim tile for variant B: a multiple of 128 dividing I."""
    if ti is not None:
        return ti if (ti % 128 == 0 and inter % ti == 0 and ti <= inter) else None
    for cand in (512, 256, 128):
        if inter % cand == 0:
            return cand
    return None


def _vmem_limit(estimate, cap):
    return int(min(max(estimate + (4 << 20), 32 << 20), int(0.90 * cap)))


# ---------------------------------------------------------------------------
# pallas_call builders.
# ---------------------------------------------------------------------------
def _resident_call(n_rows, hidden, inter, tm, out_dtype, vmem_limit,
                   single_buffer_weights):
    if single_buffer_weights:
        # Constant-index resident weights: single buffer halves their VMEM cost.
        w_in_spec = pl.BlockSpec((hidden, inter), lambda i: (0, 0),
                                 pipeline_mode=pl.Buffered(buffer_count=1))
        w_out_spec = pl.BlockSpec((inter, hidden), lambda i: (0, 0),
                                  pipeline_mode=pl.Buffered(buffer_count=1))
    else:
        w_in_spec = pl.BlockSpec((hidden, inter), lambda i: (0, 0))
        w_out_spec = pl.BlockSpec((inter, hidden), lambda i: (0, 0))

    return pl.pallas_call(
        _kernel_resident,
        out_shape=jax.ShapeDtypeStruct((n_rows, hidden), out_dtype),
        grid_spec=pltpu.PrefetchScalarGridSpec(
            num_scalar_prefetch=0,
            grid=(pl.cdiv(n_rows, tm),),
            in_specs=[
                pl.BlockSpec((tm, hidden), lambda i: (i, 0)),   # x rows (streamed)
                w_in_spec,                                      # W_in  (resident bf16)
                pl.BlockSpec((1, inter), lambda i: (0, 0)),     # b_in
                w_out_spec,                                     # W_out (resident bf16)
                pl.BlockSpec((1, hidden), lambda i: (0, 0)),    # b_out
                pl.BlockSpec((1, hidden), lambda i: (0, 0)),    # gamma
                pl.BlockSpec((1, hidden), lambda i: (0, 0)),    # beta
            ],
            out_specs=pl.BlockSpec((tm, hidden), lambda i: (i, 0)),
        ),
        compiler_params=pltpu.CompilerParams(
            dimension_semantics=("parallel",),
            vmem_limit_bytes=vmem_limit),
    )


def _ktiled_call(n_rows, hidden, inter, tm, ti, out_dtype, vmem_limit):
    return pl.pallas_call(
        _kernel_ktiled,
        out_shape=jax.ShapeDtypeStruct((n_rows, hidden), out_dtype),
        grid_spec=pltpu.PrefetchScalarGridSpec(
            num_scalar_prefetch=0,
            grid=(pl.cdiv(n_rows, tm), inter // ti),
            in_specs=[
                pl.BlockSpec((tm, hidden), lambda i, k: (i, 0)),   # x rows
                pl.BlockSpec((hidden, ti), lambda i, k: (0, k)),   # W_in block
                pl.BlockSpec((1, ti), lambda i, k: (0, k)),        # b_in block
                pl.BlockSpec((ti, hidden), lambda i, k: (k, 0)),   # W_out block
                pl.BlockSpec((1, hidden), lambda i, k: (0, 0)),    # b_out
                pl.BlockSpec((1, hidden), lambda i, k: (0, 0)),    # gamma
                pl.BlockSpec((1, hidden), lambda i, k: (0, 0)),    # beta
            ],
            out_specs=pl.BlockSpec((tm, hidden), lambda i, k: (i, 0)),
            scratch_shapes=[pltpu.VMEM((tm, hidden), jnp.float32)],
        ),
        compiler_params=pltpu.CompilerParams(
            dimension_semantics=("parallel", "arbitrary"),
            vmem_limit_bytes=vmem_limit),
    )


# ---------------------------------------------------------------------------
# Public wrapper.
# ---------------------------------------------------------------------------
def intermediate_forward(x, w_in, b_in, w_out, b_out, gamma, beta, *,
                         tm=None, ti=None, force_ktiled=False):
    """x: (B, S, H) float32. Returns (B, S, H). Dropout is identity (eval)."""
    B, S, H = x.shape
    I = w_in.shape[1]
    N = B * S
    x2 = x.reshape(N, H)

    cap = _vmem_capacity_bytes()

    # Weights as bf16 (halves resident VMEM + DMA; native MXU operand dtype).
    w_in_b = w_in.astype(jnp.bfloat16)
    w_out_b = w_out.astype(jnp.bfloat16)
    # 1-D params as (1, dim) slabs for a TPU-friendly 2-D layout (kept f32).
    b_in2 = b_in.reshape(1, I).astype(jnp.float32)
    b_out2 = b_out.reshape(1, H).astype(jnp.float32)
    gamma2 = gamma.reshape(1, H).astype(jnp.float32)
    beta2 = beta.reshape(1, H).astype(jnp.float32)
    args = (x2, w_in_b, b_in2, w_out_b, b_out2, gamma2, beta2)

    resident_sb = 2 * H * I * 2          # both weights, bf16, single-buffered
    want_ktiled = force_ktiled or (resident_sb > int(0.60 * cap))
    ti_sel = _pick_ti(I, ti) if want_ktiled else None
    # TODO(synk): mask the tail columns so the K-tiled path also supports
    # intermediate sizes that are not a multiple of 128.
    use_ktiled = ti_sel is not None and ti_sel < I

    if use_ktiled:
        streamed = 2 * 2 * (H * ti_sel + ti_sel * H) * 2   # dbuf bf16 blocks
        tm_sel = tm if tm is not None else _pick_tm(N, H, ti_sel, cap, streamed)
        per_row = 24 * H + 6 * ti_sel
        limit = _vmem_limit(streamed + tm_sel * per_row, cap)
        out = _ktiled_call(N, H, I, tm_sel, ti_sel, x.dtype, limit)(*args)
    else:
        resident_db = 2 * resident_sb                      # conservative budget
        tm_sel = tm if tm is not None else _pick_tm(N, H, I, cap, resident_db)
        per_row = 24 * H + 6 * I
        limit = _vmem_limit(resident_db + tm_sel * per_row, cap)
        out, err = None, None
        # Prefer single-buffered resident weights; fall back to the default
        # double-buffering if this jax build rejects pipeline_mode/Buffered(1).
        for single_buffer in (True, False):
            try:
                out = _resident_call(N, H, I, tm_sel, x.dtype, limit,
                                     single_buffer)(*args)
                break
            except Exception as e:   # pragma: no cover - compat fallback
                err = e
        if out is None:
            raise err

    return out.reshape(B, S, H)


# ---------------------------------------------------------------------------
# Pure-JAX reference.
# ---------------------------------------------------------------------------
def _ref_forward(x, w_in, b_in, w_out, b_out, gamma, beta, *, bf16=True):
    """bf16=True mirrors the kernel's MXU operand dtype."""
    cdt = jnp.bfloat16 if bf16 else jnp.float32
    h = jnp.dot(x.astype(cdt), w_in.astype(cdt),
                preferred_element_type=jnp.float32) + b_in
    h = jnp.maximum(h, 0.0)
    h = jnp.dot(h.astype(cdt), w_out.astype(cdt),
                preferred_element_type=jnp.float32) + b_out
    y = h + x
    u = jnp.mean(y, axis=-1, keepdims=True)
    s = jnp.mean((y - u) ** 2, axis=-1, keepdims=True)
    yn = (y - u) / jnp.sqrt(s + _LN_EPS)
    return gamma * yn + beta


if __name__ == "__main__":
    # Small shapes implied by the module: (batch, seq, hidden), intermediate=2*hidden.
    B, S, H, I = 2, 8, 32, 64

    key = jax.random.PRNGKey(0)
    kx, k1, k2, k3, k4, k5, k6, k7, k8 = jax.random.split(key, 9)

    def make_params(kw1, kb1, kw2, kb2, hidden, inter):
        lim_in = 1.0 / (hidden ** 0.5)
        lim_out = 1.0 / (inter ** 0.5)
        w_in = jax.random.uniform(kw1, (hidden, inter), jnp.float32, -lim_in, lim_in)
        b_in = jax.random.uniform(kb1, (inter,), jnp.float32, -lim_in, lim_in)
        w_out = jax.random.uniform(kw2, (inter, hidden), jnp.float32, -lim_out, lim_out)
        b_out = jax.random.uniform(kb2, (hidden,), jnp.float32, -lim_out, lim_out)
        gamma = jnp.ones((hidden,), jnp.float32)
        beta = jnp.zeros((hidden,), jnp.float32)
        return w_in, b_in, w_out, b_out, gamma, beta

    def check(out, x_in, p):
        assert out.shape == x_in.shape
        ref_b = _ref_forward(x_in, *p, bf16=True)    # mirrors bf16 MXU operands
        ref_f = _ref_forward(x_in, *p, bf16=False)   # pure-f32 module semantics
        assert jnp.allclose(out, ref_b, atol=1e-4, rtol=1e-4)
        assert jnp.allclose(out, ref_f, atol=3e-2, rtol=3e-2)

    x = jax.random.normal(kx, (B, S, H), dtype=jnp.float32)
    params = make_params(k1, k2, k3, k4, H, I)

    # 1) Default weight-resident path, exact row tiles.
    out = jax.block_until_ready(intermediate_forward(x, *params))
    check(out, x, params)

    # 2) Partial last row tile (N % tm != 0) -- no host-side pad/slice round trip.
    x_odd = x[:, :7, :]
    out_odd = jax.block_until_ready(intermediate_forward(x_odd, *params))
    check(out_odd, x_odd, params)

    # 3) K-tiled (streamed-weight) variant, exercised explicitly at small size.
    I2 = 256
    params2 = make_params(k5, k6, k7, k8, H, I2)
    out_kt = jax.block_until_ready(
        intermediate_forward(x, *params2, force_ktiled=True, ti=128))
    check(out_kt, x, params2)

    print("KERNEL_OK")
</pallas_src>

<mosaic_0001>
module attributes {stable_mosaic.version = 11 : i64} {
  func.func @_kernel_resident(%arg0: i32, %arg1: memref<16x32xf32, #tpu.memory_space<vmem>>, %arg2: memref<32x64xbf16, #tpu.memory_space<vmem>>, %arg3: memref<1x64xf32, #tpu.memory_space<vmem>>, %arg4: memref<64x32xbf16, #tpu.memory_space<vmem>>, %arg5: memref<1x32xf32, #tpu.memory_space<vmem>>, %arg6: memref<1x32xf32, #tpu.memory_space<vmem>>, %arg7: memref<1x32xf32, #tpu.memory_space<vmem>>, %arg8: memref<16x32xf32, #tpu.memory_space<vmem>>) attributes {dimension_semantics = [#tpu.dimension_semantics<parallel>], iteration_bounds = array<i64: 1>, scalar_prefetch = 0 : i64, scratch_operands = 0 : i64, tpu.core_type = #tpu.core_type<tc>, window_params = [{transform_indices = @transform_0, window_bounds = array<i64: 16, 32>}, {pipeline_mode = #tpu.pipeline_mode<synchronous>, transform_indices = @transform_1, window_bounds = array<i64: 32, 64>}, {pipeline_mode = #tpu.pipeline_mode<synchronous>, transform_indices = @transform_2, window_bounds = array<i64: 1, 64>}, {pipeline_mode = #tpu.pipeline_mode<synchronous>, transform_indices = @transform_3, window_bounds = array<i64: 64, 32>}, {pipeline_mode = #tpu.pipeline_mode<synchronous>, transform_indices = @transform_4, window_bounds = array<i64: 1, 32>}, {pipeline_mode = #tpu.pipeline_mode<synchronous>, transform_indices = @transform_5, window_bounds = array<i64: 1, 32>}, {pipeline_mode = #tpu.pipeline_mode<synchronous>, transform_indices = @transform_6, window_bounds = array<i64: 1, 32>}, {transform_indices = @transform_7, window_bounds = array<i64: 16, 32>}]} {
    %c0 = arith.constant 0 : index
    %c0_0 = arith.constant 0 : index
    %0 = vector.load %arg1[%c0, %c0_0] : memref<16x32xf32, #tpu.memory_space<vmem>>, vector<16x32xf32>
    %1 = arith.truncf %0 : vector<16x32xf32> to vector<16x32xbf16>
    %c0_1 = arith.constant 0 : index
    %c0_2 = arith.constant 0 : index
    %2 = vector.load %arg2[%c0_1, %c0_2] : memref<32x64xbf16, #tpu.memory_space<vmem>>, vector<32x64xbf16>
    %cst = arith.constant dense<0.000000e+00> : vector<16x64xf32>
    %3 = tpu.matmul %1, %2, %cst {dimension_numbers = #tpu.dot_dimension_numbers<[1], [0], [0], [1], [0, 0, 1, 1], [], []>} : vector<16x32xbf16>, vector<32x64xbf16>, vector<16x64xf32> -> vector<16x64xf32>
    %c0_3 = arith.constant 0 : index
    %c0_4 = arith.constant 0 : index
    %4 = vector.load %arg3[%c0_3, %c0_4] : memref<1x64xf32, #tpu.memory_space<vmem>>, vector<1x64xf32>
    %5 = vector.broadcast %4 : vector<1x64xf32> to vector<16x64xf32>
    %6 = arith.addf %3, %5 : vector<16x64xf32>
    %cst_5 = arith.constant 0.000000e+00 : f32
    %7 = vector.broadcast %cst_5 : f32 to vector<16x64xf32>
    %8 = arith.maximumf %6, %7 : vector<16x64xf32>
    %9 = arith.truncf %8 : vector<16x64xf32> to vector<16x64xbf16>
    %c0_6 = arith.constant 0 : index
    %c0_7 = arith.constant 0 : index
    %10 = vector.load %arg4[%c0_6, %c0_7] : memref<64x32xbf16, #tpu.memory_space<vmem>>, vector<64x32xbf16>
    %cst_8 = arith.constant dense<0.000000e+00> : vector<16x32xf32>
    %11 = tpu.matmul %9, %10, %cst_8 {dimension_numbers = #tpu.dot_dimension_numbers<[1], [0], [0], [1], [0, 0, 1, 1], [], []>} : vector<16x64xbf16>, vector<64x32xbf16>, vector<16x32xf32> -> vector<16x32xf32>
    %c0_9 = arith.constant 0 : index
    %c0_10 = arith.constant 0 : index
    %12 = vector.load %arg5[%c0_9, %c0_10] : memref<1x32xf32, #tpu.memory_space<vmem>>, vector<1x32xf32>
    %c0_11 = arith.constant 0 : index
    %c0_12 = arith.constant 0 : index
    %13 = vector.load %arg6[%c0_11, %c0_12] : memref<1x32xf32, #tpu.memory_space<vmem>>, vector<1x32xf32>
    %c0_13 = arith.constant 0 : index
    %c0_14 = arith.constant 0 : index
    %14 = vector.load %arg7[%c0_13, %c0_14] : memref<1x32xf32, #tpu.memory_space<vmem>>, vector<1x32xf32>
    %15 = vector.broadcast %12 : vector<1x32xf32> to vector<16x32xf32>
    %16 = arith.addf %11, %15 : vector<16x32xf32>
    %17 = arith.addf %16, %0 : vector<16x32xf32>
    %cst_15 = arith.constant dense<0.000000e+00> : vector<16xf32>
    %18 = vector.multi_reduction <add>, %17, %cst_15 [1] : vector<16x32xf32> to vector<16xf32>
    %19 = vector.shape_cast %18 : vector<16xf32> to vector<16x1xf32>
    %cst_16 = arith.constant 3.125000e-02 : f32
    %20 = vector.broadcast %cst_16 : f32 to vector<16x1xf32>
    %21 = arith.mulf %19, %20 : vector<16x1xf32>
    %22 = arith.mulf %17, %17 : vector<16x32xf32>
    %cst_17 = arith.constant dense<0.000000e+00> : vector<16xf32>
    %23 = vector.multi_reduction <add>, %22, %cst_17 [1] : vector<16x32xf32> to vector<16xf32>
    %24 = vector.shape_cast %23 : vector<16xf32> to vector<16x1xf32>
    %cst_18 = arith.constant 3.125000e-02 : f32
    %25 = vector.broadcast %cst_18 : f32 to vector<16x1xf32>
    %26 = arith.mulf %24, %25 : vector<16x1xf32>
    %27 = arith.mulf %21, %21 : vector<16x1xf32>
    %28 = arith.subf %26, %27 : vector<16x1xf32>
    %cst_19 = arith.constant 0.000000e+00 : f32
    %29 = vector.broadcast %cst_19 : f32 to vector<16x1xf32>
    %30 = arith.maximumf %28, %29 : vector<16x1xf32>
    %31 = vector.broadcast %21 : vector<16x1xf32> to vector<16x32xf32>
    %32 = arith.subf %17, %31 : vector<16x32xf32>
    %cst_20 = arith.constant 9.99999996E-13 : f32
    %33 = vector.broadcast %cst_20 : f32 to vector<16x1xf32>
    %34 = arith.addf %30, %33 : vector<16x1xf32>
    %35 = math.rsqrt %34 : vector<16x1xf32>
    %36 = vector.broadcast %35 : vector<16x1xf32> to vector<16x32xf32>
    %37 = arith.mulf %32, %36 : vector<16x32xf32>
    %38 = vector.broadcast %13 : vector<1x32xf32> to vector<16x32xf32>
    %39 = arith.mulf %38, %37 : vector<16x32xf32>
    %40 = vector.broadcast %14 : vector<1x32xf32> to vector<16x32xf32>
    %41 = arith.addf %39, %40 : vector<16x32xf32>
    %c0_21 = arith.constant 0 : index
    %c0_22 = arith.constant 0 : index
    %42 = vector.load %arg8[%c0_21, %c0_22] : memref<16x32xf32, #tpu.memory_space<vmem>>, vector<16x32xf32>
    tpu.vector_store %arg8[%c0_21, %c0_22], %41 {strides = array<i32>} : memref<16x32xf32, #tpu.memory_space<vmem>>, vector<16x32xf32>,
    return
  }
  func.func @transform_0(%arg0: i32) -> (i32, i32) {
    %c0_i32 = arith.constant 0 : i32
    %c0_i32_0 = arith.constant 0 : i32
    return %arg0, %c0_i32 : i32, i32
  }
  func.func @transform_1(%arg0: i32) -> (i32, i32) {
    %c0_i32 = arith.constant 0 : i32
    %c0_i32_0 = arith.constant 0 : i32
    %c0_i32_1 = arith.constant 0 : i32
    return %c0_i32, %c0_i32_0 : i32, i32
  }
  func.func @transform_2(%arg0: i32) -> (i32, i32) {
    %c0_i32 = arith.constant 0 : i32
    %c0_i32_0 = arith.constant 0 : i32
    %c0_i32_1 = arith.constant 0 : i32
    return %c0_i32, %c0_i32_0 : i32, i32
  }
  func.func @transform_3(%arg0: i32) -> (i32, i32) {
    %c0_i32 = arith.constant 0 : i32
    %c0_i32_0 = arith.constant 0 : i32
    %c0_i32_1 = arith.constant 0 : i32
    return %c0_i32, %c0_i32_0 : i32, i32
  }
  func.func @transform_4(%arg0: i32) -> (i32, i32) {
    %c0_i32 = arith.constant 0 : i32
    %c0_i32_0 = arith.constant 0 : i32
    %c0_i32_1 = arith.constant 0 : i32
    return %c0_i32, %c0_i32_0 : i32, i32
  }
  func.func @transform_5(%arg0: i32) -> (i32, i32) {
    %c0_i32 = arith.constant 0 : i32
    %c0_i32_0 = arith.constant 0 : i32
    %c0_i32_1 = arith.constant 0 : i32
    return %c0_i32, %c0_i32_0 : i32, i32
  }
  func.func @transform_6(%arg0: i32) -> (i32, i32) {
    %c0_i32 = arith.constant 0 : i32
    %c0_i32_0 = arith.constant 0 : i32
    %c0_i32_1 = arith.constant 0 : i32
    return %c0_i32, %c0_i32_0 : i32, i32
  }
  func.func @transform_7(%arg0: i32) -> (i32, i32) {
    %c0_i32 = arith.constant 0 : i32
    %c0_i32_0 = arith.constant 0 : i32
    return %arg0, %c0_i32 : i32, i32
  }
}

module attributes {stable_mosaic.version = 11 : i64} {
  func.func @_kernel_resident(%arg0: i32, %arg1: memref<16x32xf32, #tpu.memory_space<vmem>>, %arg2: memref<32x64xbf16, #tpu.memory_space<vmem>>, %arg3: memref<1x64xf32, #tpu.memory_space<vmem>>, %arg4: memref<64x32xbf16, #tpu.memory_space<vmem>>, %arg5: memref<1x32xf32, #tpu.memory_space<vmem>>, %arg6: memref<1x32xf32, #tpu.memory_space<vmem>>, %arg7: memref<1x32xf32, #tpu.memory_space<vmem>>, %arg8: memref<16x32xf32, #tpu.memory_space<vmem>>) attributes {dimension_semantics = [#tpu.dimension_semantics<parallel>], iteration_bounds = array<i64: 1>, scalar_prefetch = 0 : i64, scratch_operands = 0 : i64, tpu.core_type = #tpu.core_type<tc>, window_params = [{transform_indices = @transform_0, window_bounds = array<i64: 16, 32>}, {pipeline_mode = #tpu.pipeline_mode<synchronous>, transform_indices = @transform_1, window_bounds = array<i64: 32, 64>}, {pipeline_mode = #tpu.pipeline_mode<synchronous>, transform_indices = @transform_2, window_bounds = array<i64: 1, 64>}, {pipeline_mode = #tpu.pipeline_mode<synchronous>, transform_indices = @transform_3, window_bounds = array<i64: 64, 32>}, {pipeline_mode = #tpu.pipeline_mode<synchronous>, transform_indices = @transform_4, window_bounds = array<i64: 1, 32>}, {pipeline_mode = #tpu.pipeline_mode<synchronous>, transform_indices = @transform_5, window_bounds = array<i64: 1, 32>}, {pipeline_mode = #tpu.pipeline_mode<synchronous>, transform_indices = @transform_6, window_bounds = array<i64: 1, 32>}, {transform_indices = @transform_7, window_bounds = array<i64: 16, 32>}]} {
    %c0 = arith.constant 0 : index
    %c0_0 = arith.constant 0 : index
    %0 = vector.load %arg1[%c0, %c0_0] : memref<16x32xf32, #tpu.memory_space<vmem>>, vector<16x32xf32>
    %1 = arith.truncf %0 : vector<16x32xf32> to vector<16x32xbf16>
    %c0_1 = arith.constant 0 : index
    %c0_2 = arith.constant 0 : index
    %2 = vector.load %arg2[%c0_1, %c0_2] : memref<32x64xbf16, #tpu.memory_space<vmem>>, vector<32x64xbf16>
    %cst = arith.constant dense<0.000000e+00> : vector<16x64xf32>
    %3 = tpu.matmul %1, %2, %cst {dimension_numbers = #tpu.dot_dimension_numbers<[1], [0], [0], [1], [0, 0, 1, 1], [], []>} : vector<16x32xbf16>, vector<32x64xbf16>, vector<16x64xf32> -> vector<16x64xf32>
    %c0_3 = arith.constant 0 : index
    %c0_4 = arith.constant 0 : index
    %4 = vector.load %arg3[%c0_3, %c0_4] : memref<1x64xf32, #tpu.memory_space<vmem>>, vector<1x64xf32>
    %5 = vector.broadcast %4 : vector<1x64xf32> to vector<16x64xf32>
    %6 = arith.addf %3, %5 : vector<16x64xf32>
    %cst_5 = arith.constant 0.000000e+00 : f32
    %7 = vector.broadcast %cst_5 : f32 to vector<16x64xf32>
    %8 = arith.maximumf %6, %7 : vector<16x64xf32>
    %9 = arith.truncf %8 : vector<16x64xf32> to vector<16x64xbf16>
    %c0_6 = arith.constant 0 : index
    %c0_7 = arith.constant 0 : index
    %10 = vector.load %arg4[%c0_6, %c0_7] : memref<64x32xbf16, #tpu.memory_space<vmem>>, vector<64x32xbf16>
    %cst_8 = arith.constant dense<0.000000e+00> : vector<16x32xf32>
    %11 = tpu.matmul %9, %10, %cst_8 {dimension_numbers = #tpu.dot_dimension_numbers<[1], [0], [0], [1], [0, 0, 1, 1], [], []>} : vector<16x64xbf16>, vector<64x32xbf16>, vector<16x32xf32> -> vector<16x32xf32>
    %c0_9 = arith.constant 0 : index
    %c0_10 = arith.constant 0 : index
    %12 = vector.load %arg5[%c0_9, %c0_10] : memref<1x32xf32, #tpu.memory_space<vmem>>, vector<1x32xf32>
    %c0_11 = arith.constant 0 : index
    %c0_12 = arith.constant 0 : index
    %13 = vector.load %arg6[%c0_11, %c0_12] : memref<1x32xf32, #tpu.memory_space<vmem>>, vector<1x32xf32>
    %c0_13 = arith.constant 0 : index
    %c0_14 = arith.constant 0 : index
    %14 = vector.load %arg7[%c0_13, %c0_14] : memref<1x32xf32, #tpu.memory_space<vmem>>, vector<1x32xf32>
    %15 = vector.broadcast %12 : vector<1x32xf32> to vector<16x32xf32>
    %16 = arith.addf %11, %15 : vector<16x32xf32>
    %17 = arith.addf %16, %0 : vector<16x32xf32>
    %cst_15 = arith.constant dense<0.000000e+00> : vector<16xf32>
    %18 = vector.multi_reduction <add>, %17, %cst_15 [1] : vector<16x32xf32> to vector<16xf32>
    %19 = vector.shape_cast %18 : vector<16xf32> to vector<16x1xf32>
    %cst_16 = arith.constant 3.125000e-02 : f32
    %20 = vector.broadcast %cst_16 : f32 to vector<16x1xf32>
    %21 = arith.mulf %19, %20 : vector<16x1xf32>
    %22 = arith.mulf %17, %17 : vector<16x32xf32>
    %cst_17 = arith.constant dense<0.000000e+00> : vector<16xf32>
    %23 = vector.multi_reduction <add>, %22, %cst_17 [1] : vector<16x32xf32> to vector<16xf32>
    %24 = vector.shape_cast %23 : vector<16xf32> to vector<16x1xf32>
    %cst_18 = arith.constant 3.125000e-02 : f32
    %25 = vector.broadcast %cst_18 : f32 to vector<16x1xf32>
    %26 = arith.mulf %24, %25 : vector<16x1xf32>
    %27 = arith.mulf %21, %21 : vector<16x1xf32>
    %28 = arith.subf %26, %27 : vector<16x1xf32>
    %cst_19 = arith.constant 0.000000e+00 : f32
    %29 = vector.broadcast %cst_19 : f32 to vector<16x1xf32>
    %30 = arith.maximumf %28, %29 : vector<16x1xf32>
    %31 = vector.broadcast %21 : vector<16x1xf32> to vector<16x32xf32>
    %32 = arith.subf %17, %31 : vector<16x32xf32>
    %cst_20 = arith.constant 9.99999996E-13 : f32
    %33 = vector.broadcast %cst_20 : f32 to vector<16x1xf32>
    %34 = arith.addf %30, %33 : vector<16x1xf32>
    %35 = math.rsqrt %34 : vector<16x1xf32>
    %36 = vector.broadcast %35 : vector<16x1xf32> to vector<16x32xf32>
    %37 = arith.mulf %32, %36 : vector<16x32xf32>
    %38 = vector.broadcast %13 : vector<1x32xf32> to vector<16x32xf32>
    %39 = arith.mulf %38, %37 : vector<16x32xf32>
    %40 = vector.broadcast %14 : vector<1x32xf32> to vector<16x32xf32>
    %41 = arith.addf %39, %40 : vector<16x32xf32>
    %c0_21 = arith.constant 0 : index
    %c0_22 = arith.constant 0 : index
    %42 = vector.load %arg8[%c0_21, %c0_22] : memref<16x32xf32, #tpu.memory_space<vmem>>, vector<16x32xf32>
    tpu.vector_store %arg8[%c0_21, %c0_22], %41 {strides = array<i32>} : memref<16x32xf32, #tpu.memory_space<vmem>>, vector<16x32xf32>,
    return
  }
  func.func @transform_0(%arg0: i32) -> (i32, i32) {
    %c0_i32 = arith.constant 0 : i32
    %c0_i32_0 = arith.constant 0 : i32
    return %arg0, %c0_i32 : i32, i32
  }
  func.func @transform_1(%arg0: i32) -> (i32, i32) {
    %c0_i32 = arith.constant 0 : i32
    %c0_i32_0 = arith.constant 0 : i32
    %c0_i32_1 = arith.constant 0 : i32
    return %c0_i32, %c0_i32_0 : i32, i32
  }
  func.func @transform_2(%arg0: i32) -> (i32, i32) {
    %c0_i32 = arith.constant 0 : i32
    %c0_i32_0 = arith.constant 0 : i32
    %c0_i32_1 = arith.constant 0 : i32
    return %c0_i32, %c0_i32_0 : i32, i32
  }
  func.func @transform_3(%arg0: i32) -> (i32, i32) {
    %c0_i32 = arith.constant 0 : i32
    %c0_i32_0 = arith.constant 0 : i32
    %c0_i32_1 = arith.constant 0 : i32
    return %c0_i32, %c0_i32_0 : i32, i32
  }
  func.func @transform_4(%arg0: i32) -> (i32, i32) {
    %c0_i32 = arith.constant 0 : i32
    %c0_i32_0 = arith.constant 0 : i32
    %c0_i32_1 = arith.constant 0 : i32
    return %c0_i32, %c0_i32_0 : i32, i32
  }
  func.func @transform_5(%arg0: i32) -> (i32, i32) {
    %c0_i32 = arith.constant 0 : i32
    %c0_i32_0 = arith.constant 0 : i32
    %c0_i32_1 = arith.constant 0 : i32
    return %c0_i32, %c0_i32_0 : i32, i32
  }
  func.func @transform_6(%arg0: i32) -> (i32, i32) {
    %c0_i32 = arith.constant 0 : i32
    %c0_i32_0 = arith.constant 0 : i32
    %c0_i32_1 = arith.constant 0 : i32
    return %c0_i32, %c0_i32_0 : i32, i32
  }
  func.func @transform_7(%arg0: i32) -> (i32, i32) {
    %c0_i32 = arith.constant 0 : i32
    %c0_i32_0 = arith.constant 0 : i32
    return %arg0, %c0_i32 : i32, i32
  }
}

</mosaic_0001>

<bundles_post_ra>
// kernel: tpu_custom_call.1
= control target key start
LH: loop header
LB: loop body
LE: loop exit
PB: predicated region body
PF: predicated region fallthrough
CT: control target
= control target key end

     0   :  { %v335_v1 = vmov 0.0   ;;  %vm336_vm0 = vmmov 0   ;;  %vm54_vm1 = vcmask 261120   ;;  %s435_s0 = inlined_call_operand.vmem [shape: f32[16,32], index: 0, kind: input, shape index: {}]   ;;  %s436_s1 = inlined_call_operand.vmem [shape: bf16[32,64], index: 1, kind: input, shape index: {}]   ;;  %s437_s2 = inlined_call_operand.vmem [shape: f32[1,64], index: 2, kind: input, shape index: {}]   ;;  %s438_s3 = inlined_call_operand.vmem [shape: bf16[64,32], index: 3, kind: input, shape index: {}]   ;;  %s439_s4 = inlined_call_operand.vmem [shape: f32[1,32], index: 4, kind: input, shape index: {}]   ;;  %s440_s5 = inlined_call_operand.vmem [shape: f32[1,32], index: 5, kind: input, shape index: {}]   ;;  %s441_s6 = inlined_call_operand.vmem [shape: f32[1,32], index: 6, kind: input, shape index: {}]   ;;  %s442_s7 = inlined_call_operand.hbm [shape: f32[16,32], index: 7, kind: output, shape index: {}]  }
   0x1   :  { %v301_v0 = vld [vmem:[%s436_s1] sm:$0xff]   ;;  %276 = vmatprep.subr.bf16.mxu0 %v335_v1  ;;  %v302_v2 = vld [vmem:[%s436_s1 + $0x8] sm:$0xff]   ;;  %284 = vmatprep.subr.bf16.mxu1 %v335_v1 }
   0x2   :  { %277 = vmatpush3.bf16.msra.mxu0 %v301_v0  ;;  %280 = vmatprep.mubr.msk.bf16.mxu0 %vm336_vm0, %v335_v1  ;;  %v28_v3 = vld [vmem:[%s435_s0] sm:$0xff]  ;;  %v29_v4 = vld [vmem:[%s435_s0 + $0x8] sm:$0xff] }
   0x3   :  { %278 = vmatprep.subr.bf16.mxu0 %v335_v1  ;;  %v303_v5 = vld [vmem:[%s438_s3] sm:$0xff]   ;;  %292 = vmatprep.mubr.msk.bf16.mxu1 %vm336_vm0, %v335_v1  ;;  %v304_v6 = vld [vmem:[%s438_s3 + $0x8] sm:$0xff]   ;;  %v30_v7 = vpack.c.bf16 %v29_v4, %v28_v3 }
   0x4   :  { %285 = vmatpush3.bf16.msra.mxu1 %v303_v5 }
   0x5   :  { %286 = vmatprep.subr.bf16.mxu1 %v335_v1 }
   0x6   :  { %279 = vmatpush3.bf16.msra.mxu0 %v302_v2 }
   0x7   :  { %12 = vsyncpa [#allocation3], 0  ;;  %v305_v8 = vld [vmem:[%s438_s3 + $0x10] sm:$0xff]   ;;  %v306_v9 = vld [vmem:[%s438_s3 + $0x18] sm:$0xff]   ;;  %vm143_vm2 = vcmask 523264   ;;  %s337_s20 = smov [#allocation2]  }
   0x8   :  { %287 = vmatpush3.bf16.msra.mxu1 %v304_v6  ;;  %v256_v10 = vld [vmem:[%s437_s2] ss:$0 sm:$0xff]  ;;  %s245_s21 = sshll.u32 %s337_s20, 4  ;;  %s246_s21 = int_to_ptr.vmem [resolvable:$true] %s245_s21 }
   0x9   :  { %281 = vmatmul.mubr.msk.bf16.vlgmr.msra.gmra.mrb[0].mxu0 %vm54_vm1, %v30_v7  ;;  %288 = vmatprep.subr.bf16.mxu1 %v335_v1  ;;  %v260_v20 = vld [vmem:[%s439_s4] ss:$0 sm:$0xff]  ;;  %p316_p1 = scmp.lt.s32.totalorder %s246_s21, %s246_s21 }
   0xa   :  { %v266_v53 = vld [vmem:[%s440_s5] ss:$0 sm:$0xff]  ;;  %s311_s5 = scalar_lea.vmem %s246_s21, 256 }
   0xb   :  { %v267_v55 = vld [vmem:[%s441_s6] ss:$0 sm:$0xff]  ;;  %p312_p0 = scmp.ne.s32.totalorder %s246_s21, %s311_s5  ;;  %p317_p2 = scmp.lt.s32.totalorder %s311_s5, %s311_s5 }
   0xc   :  { %289 = vmatpush3.bf16.msra.mxu1 %v305_v8 }
   0xd   :  { %290 = vmatprep.subr.bf16.mxu1 %v335_v1  ;;  %p318_p3 = por %p317_p2, %p316_p1 }
   0xf   :  { %p319_p4 = pnand %p318_p3, %p312_p0 }
  0x10   :  { %291 = vmatpush3.bf16.msra.mxu1 %v306_v9 }
  0xdc   :  { %v92_v11 = vpop.f32.mrb[0].mxu0 }
  0xdd   :  { %v93_v12 = vadd.f32 %v256_v10, %v92_v11  ;;  %v282_v13 = vpop.f32.mrb[1].mxu0 }
  0xde   :  { %v95_v14 = vpop.f32.mrb[2].mxu0 }
  0xdf   :  { %v96_v15 = vadd.f32 %v256_v10, %v95_v14  ;;  %v283_v16 = vpop.f32.mrb[3].mxu0  ;;  %v99_v17 = vmax.f32 %v93_v12, 0.0 }
  0xe1   :  { %v100_v18 = vmax.f32 %v96_v15, 0.0 }
  0xe3   :  { %v101_v19 = vpack.c.bf16 %v100_v18, %v99_v17 }
  0xe5   :  { %293 = vmatmul.mubr.msk.bf16.vlgmr.msra.gmra.mrb[0].mxu1 %vm143_vm2, %v101_v19 }
 0x1b8   :  { %v181_v21 = vpop.f32.mrb[0].mxu1 }
 0x1b9   :  { %v182_v22 = vadd.f32 %v260_v20, %v181_v21  ;;  %v294_v23 = vpop.f32.mrb[1].mxu1 }
 0x1ba   :  { %v184_v24 = vpop.f32.mrb[2].mxu1 }
 0x1bb   :  { %v188_v25 = vadd.f32 %v182_v22, %v28_v3  ;;  %v185_v26 = vadd.f32 %v260_v20, %v184_v24  ;;  %v295_v27 = vpop.f32.mrb[3].mxu1 }
 0x1bd   :  { %v189_v28 = vadd.f32 %v185_v26, %v29_v4  ;;  %v190_v29 = vsel %vm54_vm1, %v188_v25, 0.0  ;;  %v198_v30 = vmul.f32 %v188_v25, %v188_v25 }
 0x1be   :  { %191 = vadd.xlane.f32.xlu0 %v190_v29 }
 0x1bf   :  { %v200_v31 = vsel %vm54_vm1, %v198_v30, 0.0  ;;  %v199_v32 = vmul.f32 %v189_v28, %v189_v28  ;;  %v193_v33 = vsel %vm54_vm1, %v189_v28, 0.0 }
 0x1c0   :  { %201 = vadd.xlane.f32.xlu1 %v200_v31 }
 0x1c1   :  { %v203_v34 = vsel %vm54_vm1, %v199_v32, 0.0 }
 0x1c2   :  { %194 = vadd.xlane.f32.xlu0 %v193_v33 }
 0x1c4   :  { %204 = vadd.xlane.f32.xlu1 %v203_v34 }
 0x24b   :  { %v192_v35 = vpop.xlane.xlu0 %191 }
 0x24c   :  { %v196_v36 = vmul.f32 0.03125, %v192_v35 }
 0x24d   :  { %v202_v37 = vpop.xlane.xlu1 %201 }
 0x24e   :  { %v208_v38 = vmul.f32 %v196_v36, %v196_v36  ;;  %v206_v39 = vmul.f32 0.03125, %v202_v37  ;;  %v214_v51 = vsub.f32 %v188_v25, %v196_v36 }
 0x24f   :  { %v195_v40 = vpop.xlane.xlu0 %194 }
 0x250   :  { %v210_v41 = vsub.f32 %v206_v39, %v208_v38  ;;  %v197_v42 = vmul.f32 0.03125, %v195_v40 }
 0x251   :  { %v205_v43 = vpop.xlane.xlu1 %204 }
 0x252   :  { %v212_v44 = vmax.f32 %v210_v41, 0.0  ;;  %v209_v45 = vmul.f32 %v197_v42, %v197_v42  ;;  %v207_v46 = vmul.f32 0.03125, %v205_v43  ;;  %v215_v56 = vsub.f32 %v189_v28, %v197_v42 }
 0x254   :  { %v216_v47 = vadd.f32 1e-12, %v212_v44  ;;  %v211_v48 = vsub.f32 %v207_v46, %v209_v45 }
 0x256   :  { %307 = vrsqrt.f32 %v216_v47  ;;  %v213_v49 = vmax.f32 %v211_v48, 0.0 }
 0x258   :  { %v217_v50 = vadd.f32 1e-12, %v213_v49 }
 0x25a   :  { %309 = vrsqrt.f32 %v217_v50 }
 0x260   :  { %v308_v52 = vpop.eup %307 }
 0x261   :  { %v220_v54 = vmul.f32 %v308_v52, %v214_v51 }
 0x263   :  { %v228_v57 = vmul.f32 %v266_v53, %v220_v54 }
 0x264   :  { %v310_v58 = vpop.eup %309 }
 0x265   :  { %v221_v59 = vmul.f32 %v310_v58, %v215_v56  ;;  %v236_v60 = vadd.f32 %v267_v55, %v228_v57 }
 0x267   :  { %v229_v61 = vmul.f32 %v266_v53, %v221_v59  ;;  %238 = vst.msk [vmem:[#allocation2] sm:$0xff] %vm54_vm1, %v236_v60 }
 0x269   :  { %v237_v62 = vadd.f32 %v267_v55, %v229_v61 }
 0x26b   :  { %239 = vst.msk [vmem:[#allocation2 + $0x8] sm:$0xff] %vm54_vm1, %v237_v62 }
 0x26c   :  { %322 = shalt.err (!%p319_p4)
}
 0x26d   :  { %s323_s23 = scalar_lea.hbm %s442_s7, 256 }
 0x26e   :  { %p324_p5 = scmp.ne.s32.totalorder %s442_s7, %s323_s23  ;;  %p327_p6 = scmp.lt.u32.totalorder %s323_s23, %s442_s7 }
 0x270   :  { %p329_p7 = pnand %p327_p6, %p324_p5 }
 0x272   :  { %332 = shalt.err (!%p329_p7)
}
 0x273   :  { %s338_s28 = smov 128   ;;  %s339_s29 = smov 8  }
 0x274   :  { %251 = dma.vmem_to_hbm [thread:$0]  %s246_s21, 256, %s442_s7, [#allocation3], %s338_s28, %s338_s28, %s339_s29  }
 0x275   :  { %333 = dma.done.wait [#allocation3], 256  }
 0x276   :  { %334 = vsyncadd [#allocation3], 4294967040 }
 0x277   :  { %255 = vsyncpa [#allocation3], 1 }

// kernel: tpu_custom_call.1
= control target key start
LH: loop header
LB: loop body
LE: loop exit
PB: predicated region body
PF: predicated region fallthrough
CT: control target
= control target key end

     0   :  { %v335_v1 = vmov 0.0   ;;  %vm336_vm0 = vmmov 0   ;;  %vm54_vm1 = vcmask 261120   ;;  %s435_s0 = inlined_call_operand.vmem [shape: f32[16,32], index: 0, kind: input, shape index: {}]   ;;  %s436_s1 = inlined_call_operand.vmem [shape: bf16[32,64], index: 1, kind: input, shape index: {}]   ;;  %s437_s2 = inlined_call_operand.vmem [shape: f32[1,64], index: 2, kind: input, shape index: {}]   ;;  %s438_s3 = inlined_call_operand.vmem [shape: bf16[64,32], index: 3, kind: input, shape index: {}]   ;;  %s439_s4 = inlined_call_operand.vmem [shape: f32[1,32], index: 4, kind: input, shape index: {}]   ;;  %s440_s5 = inlined_call_operand.vmem [shape: f32[1,32], index: 5, kind: input, shape index: {}]   ;;  %s441_s6 = inlined_call_operand.vmem [shape: f32[1,32], index: 6, kind: input, shape index: {}]   ;;  %s442_s7 = inlined_call_operand.hbm [shape: f32[16,32], index: 7, kind: output, shape index: {}]  }
   0x1   :  { %v301_v0 = vld [vmem:[%s436_s1] sm:$0xff]   ;;  %276 = vmatprep.subr.bf16.mxu0 %v335_v1  ;;  %v302_v2 = vld [vmem:[%s436_s1 + $0x8] sm:$0xff]   ;;  %284 = vmatprep.subr.bf16.mxu1 %v335_v1 }
   0x2   :  { %277 = vmatpush3.bf16.msra.mxu0 %v301_v0  ;;  %280 = vmatprep.mubr.msk.bf16.mxu0 %vm336_vm0, %v335_v1  ;;  %v28_v3 = vld [vmem:[%s435_s0] sm:$0xff]  ;;  %v29_v4 = vld [vmem:[%s435_s0 + $0x8] sm:$0xff] }
   0x3   :  { %278 = vmatprep.subr.bf16.mxu0 %v335_v1  ;;  %v303_v5 = vld [vmem:[%s438_s3] sm:$0xff]   ;;  %292 = vmatprep.mubr.msk.bf16.mxu1 %vm336_vm0, %v335_v1  ;;  %v304_v6 = vld [vmem:[%s438_s3 + $0x8] sm:$0xff]   ;;  %v30_v7 = vpack.c.bf16 %v29_v4, %v28_v3 }
   0x4   :  { %285 = vmatpush3.bf16.msra.mxu1 %v303_v5 }
   0x5   :  { %286 = vmatprep.subr.bf16.mxu1 %v335_v1 }
   0x6   :  { %279 = vmatpush3.bf16.msra.mxu0 %v302_v2 }
   0x7   :  { %12 = vsyncpa [#allocation3], 0  ;;  %v305_v8 = vld [vmem:[%s438_s3 + $0x10] sm:$0xff]   ;;  %v306_v9 = vld [vmem:[%s438_s3 + $0x18] sm:$0xff]   ;;  %vm143_vm2 = vcmask 523264   ;;  %s337_s20 = smov [#allocation2]  }
   0x8   :  { %287 = vmatpush3.bf16.msra.mxu1 %v304_v6  ;;  %v256_v10 = vld [vmem:[%s437_s2] ss:$0 sm:$0xff]  ;;  %s245_s21 = sshll.u32 %s337_s20, 4  ;;  %s246_s21 = int_to_ptr.vmem [resolvable:$true] %s245_s21 }
   0x9   :  { %281 = vmatmul.mubr.msk.bf16.vlgmr.msra.gmra.mrb[0].mxu0 %vm54_vm1, %v30_v7  ;;  %288 = vmatprep.subr.bf16.mxu1 %v335_v1  ;;  %v260_v20 = vld [vmem:[%s439_s4] ss:$0 sm:$0xff]  ;;  %p316_p1 = scmp.lt.s32.totalorder %s246_s21, %s246_s21 }
   0xa   :  { %v266_v53 = vld [vmem:[%s440_s5] ss:$0 sm:$0xff]  ;;  %s311_s5 = scalar_lea.vmem %s246_s21, 256 }
   0xb   :  { %v267_v55 = vld [vmem:[%s441_s6] ss:$0 sm:$0xff]  ;;  %p312_p0 = scmp.ne.s32.totalorder %s246_s21, %s311_s5  ;;  %p317_p2 = scmp.lt.s32.totalorder %s311_s5, %s311_s5 }
   0xc   :  { %289 = vmatpush3.bf16.msra.mxu1 %v305_v8 }
   0xd   :  { %290 = vmatprep.subr.bf16.mxu1 %v335_v1  ;;  %p318_p3 = por %p317_p2, %p316_p1 }
   0xf   :  { %p319_p4 = pnand %p318_p3, %p312_p0 }
  0x10   :  { %291 = vmatpush3.bf16.msra.mxu1 %v306_v9 }
  0xdc   :  { %v92_v11 = vpop.f32.mrb[0].mxu0 }
  0xdd   :  { %v93_v12 = vadd.f32 %v256_v10, %v92_v11  ;;  %v282_v13 = vpop.f32.mrb[1].mxu0 }
  0xde   :  { %v95_v14 = vpop.f32.mrb[2].mxu0 }
  0xdf   :  { %v96_v15 = vadd.f32 %v256_v10, %v95_v14  ;;  %v283_v16 = vpop.f32.mrb[3].mxu0  ;;  %v99_v17 = vmax.f32 %v93_v12, 0.0 }
  0xe1   :  { %v100_v18 = vmax.f32 %v96_v15, 0.0 }
  0xe3   :  { %v101_v19 = vpack.c.bf16 %v100_v18, %v99_v17 }
  0xe5   :  { %293 = vmatmul.mubr.msk.bf16.vlgmr.msra.gmra.mrb[0].mxu1 %vm143_vm2, %v101_v19 }
 0x1b8   :  { %v181_v21 = vpop.f32.mrb[0].mxu1 }
 0x1b9   :  { %v182_v22 = vadd.f32 %v260_v20, %v181_v21  ;;  %v294_v23 = vpop.f32.mrb[1].mxu1 }
 0x1ba   :  { %v184_v24 = vpop.f32.mrb[2].mxu1 }
 0x1bb   :  { %v188_v25 = vadd.f32 %v182_v22, %v28_v3  ;;  %v185_v26 = vadd.f32 %v260_v20, %v184_v24  ;;  %v295_v27 = vpop.f32.mrb[3].mxu1 }
 0x1bd   :  { %v189_v28 = vadd.f32 %v185_v26, %v29_v4  ;;  %v190_v29 = vsel %vm54_vm1, %v188_v25, 0.0  ;;  %v198_v30 = vmul.f32 %v188_v25, %v188_v25 }
 0x1be   :  { %191 = vadd.xlane.f32.xlu0 %v190_v29 }
 0x1bf   :  { %v200_v31 = vsel %vm54_vm1, %v198_v30, 0.0  ;;  %v199_v32 = vmul.f32 %v189_v28, %v189_v28  ;;  %v193_v33 = vsel %vm54_vm1, %v189_v28, 0.0 }
 0x1c0   :  { %201 = vadd.xlane.f32.xlu1 %v200_v31 }
 0x1c1   :  { %v203_v34 = vsel %vm54_vm1, %v199_v32, 0.0 }
 0x1c2   :  { %194 = vadd.xlane.f32.xlu0 %v193_v33 }
 0x1c4   :  { %204 = vadd.xlane.f32.xlu1 %v203_v34 }
 0x24b   :  { %v192_v35 = vpop.xlane.xlu0 %191 }
 0x24c   :  { %v196_v36 = vmul.f32 0.03125, %v192_v35 }
 0x24d   :  { %v202_v37 = vpop.xlane.xlu1 %201 }
 0x24e   :  { %v208_v38 = vmul.f32 %v196_v36, %v196_v36  ;;  %v206_v39 = vmul.f32 0.03125, %v202_v37  ;;  %v214_v51 = vsub.f32 %v188_v25, %v196_v36 }
 0x24f   :  { %v195_v40 = vpop.xlane.xlu0 %194 }
 0x250   :  { %v210_v41 = vsub.f32 %v206_v39, %v208_v38  ;;  %v197_v42 = vmul.f32 0.03125, %v195_v40 }
 0x251   :  { %v205_v43 = vpop.xlane.xlu1 %204 }
 0x252   :  { %v212_v44 = vmax.f32 %v210_v41, 0.0  ;;  %v209_v45 = vmul.f32 %v197_v42, %v197_v42  ;;  %v207_v46 = vmul.f32 0.03125, %v205_v43  ;;  %v215_v56 = vsub.f32 %v189_v28, %v197_v42 }
 0x254   :  { %v216_v47 = vadd.f32 1e-12, %v212_v44  ;;  %v211_v48 = vsub.f32 %v207_v46, %v209_v45 }
 0x256   :  { %307 = vrsqrt.f32 %v216_v47  ;;  %v213_v49 = vmax.f32 %v211_v48, 0.0 }
 0x258   :  { %v217_v50 = vadd.f32 1e-12, %v213_v49 }
 0x25a   :  { %309 = vrsqrt.f32 %v217_v50 }
 0x260   :  { %v308_v52 = vpop.eup %307 }
 0x261   :  { %v220_v54 = vmul.f32 %v308_v52, %v214_v51 }
 0x263   :  { %v228_v57 = vmul.f32 %v266_v53, %v220_v54 }
 0x264   :  { %v310_v58 = vpop.eup %309 }
 0x265   :  { %v221_v59 = vmul.f32 %v310_v58, %v215_v56  ;;  %v236_v60 = vadd.f32 %v267_v55, %v228_v57 }
 0x267   :  { %v229_v61 = vmul.f32 %v266_v53, %v221_v59  ;;  %238 = vst.msk [vmem:[#allocation2] sm:$0xff] %vm54_vm1, %v236_v60 }
 0x269   :  { %v237_v62 = vadd.f32 %v267_v55, %v229_v61 }
 0x26b   :  { %239 = vst.msk [vmem:[#allocation2 + $0x8] sm:$0xff] %vm54_vm1, %v237_v62 }
 0x26c   :  { %322 = shalt.err (!%p319_p4)
}
 0x26d   :  { %s323_s23 = scalar_lea.hbm %s442_s7, 256 }
 0x26e   :  { %p324_p5 = scmp.ne.s32.totalorder %s442_s7, %s323_s23  ;;  %p327_p6 = scmp.lt.u32.totalorder %s323_s23, %s442_s7 }
 0x270   :  { %p329_p7 = pnand %p327_p6, %p324_p5 }
 0x272   :  { %332 = shalt.err (!%p329_p7)
}
 0x273   :  { %s338_s28 = smov 128   ;;  %s339_s29 = smov 8  }
 0x274   :  { %251 = dma.vmem_to_hbm [thread:$0]  %s246_s21, 256, %s442_s7, [#allocation3], %s338_s28, %s338_s28, %s339_s29  }
 0x275   :  { %333 = dma.done.wait [#allocation3], 256  }
 0x276   :  { %334 = vsyncadd [#allocation3], 4294967040 }
 0x277   :  { %255 = vsyncpa [#allocation3], 1 }

</bundles_post_ra>
